<compile_context>
chip_gen: v5e
topology: v5e:2x2
jax: 0.10.0
libtpu: 0.0.40
codegen_flags: <defaults>
</compile_context>

<pallas_src>
import math
import functools

import numpy as np
import jax
import jax.numpy as jnp
from jax.experimental import pallas as pl
from jax.experimental.pallas import tpu as pltpu


def _gaussian_1d(kernel_size: int, sigma: float):
    """Normalized 1D Gaussian taps as Python floats (trace-time constants).

    The PyTorch module builds outer(g, g) and normalizes the 2D kernel; since
    sum(outer(g, g)) == sum(g)^2, normalizing the 1D taps and running two 1D
    passes is mathematically identical (only fp rounding order differs).
    """
    coords = np.arange(kernel_size, dtype=np.float64)
    mean = (kernel_size - 1) / 2.0
    g = np.exp(-((coords - mean) ** 2) / (2.0 * sigma ** 2)) / (
        sigma * math.sqrt(2.0 * math.pi)
    )
    g = g / g.sum()
    return tuple(float(v) for v in g)


def _smooth_kernel(x_ref, o_ref, *, g1d, K: int, H_out: int, W_out: int):
    # x_ref: (block_nc, H, W) NCHW-native block (W on lanes, H on sublanes).
    # o_ref: (block_nc, H_out, W_out).
    # Single hoisted load + f32 cast (v5e VPU has no bf16 math).
    x = x_ref[...].astype(jnp.float32)

    # Row pass along W (lane axis).
    tmp = g1d[0] * x[:, :, 0:W_out]
    for dw in range(1, K):
        tmp = tmp + g1d[dw] * x[:, :, dw:dw + W_out]

    # Column pass along H (sublane axis).
    acc = g1d[0] * tmp[:, 0:H_out, :]
    for dh in range(1, K):
        acc = acc + g1d[dh] * tmp[:, dh:dh + H_out, :]

    o_ref[...] = acc.astype(o_ref.dtype)


def _vmem_numbers():
    """(block budget, vmem_limit_bytes) sized for the actual chip's VMEM."""
    try:
        phys = int(pltpu.get_tpu_info().vmem_capacity_bytes)
    except Exception:
        phys = 64 * 1024 * 1024          # conservative: assume v7x-sized VMEM
    budget = min(max(phys // 4, 12 * 1024 * 1024), 40 * 1024 * 1024)
    limit = min(3 * phys // 4, 96 * 1024 * 1024)
    return budget, limit


def _pick_block_nc(NC, H, W, H_out, W_out, itemsize, budget):
    """Largest (n,c)-plane block whose real VMEM footprint fits the budget."""
    # Per-plane bytes per grid step:
    #   double-buffered input tile  : 2 * H*W*itemsize
    #   double-buffered output tile : 2 * H_out*W_out*itemsize
    #   in-kernel f32 intermediates : ~4 * H*W*4 (x cast, row pass, col pass, temps)
    per_plane = 2 * (H * W + H_out * W_out) * itemsize + 4 * H * W * 4
    max_nc = max(1, budget // per_plane)
    # TODO(synk): halo-tiled H blocks for planes whose single-plane footprint
    #             exceeds the VMEM budget (very large H*W images).
    block = min(NC, max_nc)
    if NC >= 2:
        # Guarantee >= 2 grid steps so ("parallel",) can use both v7x TensorCores.
        block = min(block, pl.cdiv(NC, 2))
    # Prefer an exact divisor of NC (no partial tail block) when one is close.
    for cand in range(block, 0, -1):
        if NC % cand == 0:
            if 2 * cand >= block:
                return int(cand)
            break
    return int(block)


def gaussian_smoothing(x: jnp.ndarray, kernel_size: int = 3, sigma: float = 0.5) -> jnp.ndarray:
    """Depthwise Gaussian smoothing of an NCHW tensor (valid conv, groups=C)."""
    N, C, H, W = x.shape
    K = int(kernel_size)
    if H < K or W < K:
        raise ValueError("spatial dims must be >= kernel_size")
    H_out, W_out = H - K + 1, W - K + 1
    NC = N * C

    g1d = _gaussian_1d(K, float(sigma))

    # Free reshape (merges leading axes only) -- no HBM relayout pass.
    x_flat = x.reshape(NC, H, W)

    budget, vmem_limit = _vmem_numbers()
    block_nc = _pick_block_nc(NC, H, W, H_out, W_out, x.dtype.itemsize, budget)
    grid_nc = pl.cdiv(NC, block_nc)

    kernel = functools.partial(_smooth_kernel, g1d=g1d, K=K, H_out=H_out, W_out=W_out)

    out_flat = pl.pallas_call(
        kernel,
        out_shape=jax.ShapeDtypeStruct((NC, H_out, W_out), x.dtype),
        grid_spec=pltpu.PrefetchScalarGridSpec(
            num_scalar_prefetch=0,
            grid=(grid_nc,),
            in_specs=[
                # Full (H, W) plane per channel block; last-two block dims equal
                # the full array extents, satisfying the (8, 128) tiling rule.
                pl.BlockSpec((block_nc, H, W), lambda i: (i, 0, 0)),
            ],
            out_specs=pl.BlockSpec((block_nc, H_out, W_out), lambda i: (i, 0, 0)),
        ),
        compiler_params=pltpu.CompilerParams(
            dimension_semantics=("parallel",),
            vmem_limit_bytes=int(vmem_limit),
        ),
    )(x_flat)

    # Free reshape back to NCHW.
    return out_flat.reshape(N, C, H_out, W_out)


def _reference(x: jnp.ndarray, kernel_size: int = 3, sigma: float = 0.5) -> jnp.ndarray:
    """Pure-JAX reference: depthwise valid conv (matches F.conv2d, groups=C)."""
    N, C, H, W = x.shape
    coords = jnp.arange(kernel_size, dtype=jnp.float32)
    mean = (kernel_size - 1) / 2.0
    g = jnp.exp(-((coords - mean) ** 2) / (2.0 * sigma ** 2)) / (
        sigma * math.sqrt(2.0 * math.pi)
    )
    k2d = jnp.outer(g, g)
    k2d = k2d / jnp.sum(k2d)
    w = jnp.broadcast_to(k2d[None, None], (C, 1, kernel_size, kernel_size))
    return jax.lax.conv_general_dilated(
        x, w, window_strides=(1, 1), padding="VALID",
        dimension_numbers=("NCHW", "OIHW", "NCHW"),
        feature_group_count=C,
    )


if __name__ == "__main__":
    key = jax.random.PRNGKey(0)
    N, C, H, W = 2, 4, 16, 16
    x = jax.random.normal(key, (N, C, H, W), dtype=jnp.float32)

    out = gaussian_smoothing(x, kernel_size=3, sigma=0.5)
    out = jax.block_until_ready(out)

    ref = _reference(x, kernel_size=3, sigma=0.5)
    assert out.shape == (N, C, H - 2, W - 2), out.shape
    max_err = float(jnp.max(jnp.abs(out - ref)))
    assert jnp.allclose(out, ref, atol=1e-5, rtol=1e-5), max_err

    print("KERNEL_OK")
</pallas_src>

<mosaic_0001>
module attributes {stable_mosaic.version = 11 : i64} {
  func.func @_smooth_kernel(%arg0: i32, %arg1: memref<4x16x16xf32, #tpu.memory_space<vmem>>, %arg2: memref<4x14x14xf32, #tpu.memory_space<vmem>>) attributes {dimension_semantics = [#tpu.dimension_semantics<parallel>], iteration_bounds = array<i64: 2>, scalar_prefetch = 0 : i64, scratch_operands = 0 : i64, tpu.core_type = #tpu.core_type<tc>, window_params = [{transform_indices = @transform_0, window_bounds = array<i64: 4, 16, 16>}, {transform_indices = @transform_1, window_bounds = array<i64: 4, 14, 14>}]} {
    %c0 = arith.constant 0 : index
    %c0_0 = arith.constant 0 : index
    %c0_1 = arith.constant 0 : index
    %0 = vector.load %arg1[%c0, %c0_0, %c0_1] : memref<4x16x16xf32, #tpu.memory_space<vmem>>, vector<4x16x16xf32>
    %1 = vector.extract_strided_slice %0 {offsets = [0, 0, 0], sizes = [4, 16, 14], strides = [1, 1, 1]} : vector<4x16x16xf32> to vector<4x16x14xf32>
    %cst = arith.constant 0.106506981 : f32
    %2 = vector.broadcast %cst : f32 to vector<4x16x14xf32>
    %3 = arith.mulf %2, %1 : vector<4x16x14xf32>
    %4 = vector.extract_strided_slice %0 {offsets = [0, 0, 1], sizes = [4, 16, 14], strides = [1, 1, 1]} : vector<4x16x16xf32> to vector<4x16x14xf32>
    %cst_2 = arith.constant 0.786986052 : f32
    %5 = vector.broadcast %cst_2 : f32 to vector<4x16x14xf32>
    %6 = arith.mulf %5, %4 : vector<4x16x14xf32>
    %7 = arith.addf %3, %6 : vector<4x16x14xf32>
    %8 = vector.extract_strided_slice %0 {offsets = [0, 0, 2], sizes = [4, 16, 14], strides = [1, 1, 1]} : vector<4x16x16xf32> to vector<4x16x14xf32>
    %cst_3 = arith.constant 0.106506981 : f32
    %9 = vector.broadcast %cst_3 : f32 to vector<4x16x14xf32>
    %10 = arith.mulf %9, %8 : vector<4x16x14xf32>
    %11 = arith.addf %7, %10 : vector<4x16x14xf32>
    %12 = vector.extract_strided_slice %11 {offsets = [0, 0, 0], sizes = [4, 14, 14], strides = [1, 1, 1]} : vector<4x16x14xf32> to vector<4x14x14xf32>
    %cst_4 = arith.constant 0.106506981 : f32
    %13 = vector.broadcast %cst_4 : f32 to vector<4x14x14xf32>
    %14 = arith.mulf %13, %12 : vector<4x14x14xf32>
    %15 = vector.extract_strided_slice %11 {offsets = [0, 1, 0], sizes = [4, 14, 14], strides = [1, 1, 1]} : vector<4x16x14xf32> to vector<4x14x14xf32>
    %cst_5 = arith.constant 0.786986052 : f32
    %16 = vector.broadcast %cst_5 : f32 to vector<4x14x14xf32>
    %17 = arith.mulf %16, %15 : vector<4x14x14xf32>
    %18 = arith.addf %14, %17 : vector<4x14x14xf32>
    %19 = vector.extract_strided_slice %11 {offsets = [0, 2, 0], sizes = [4, 14, 14], strides = [1, 1, 1]} : vector<4x16x14xf32> to vector<4x14x14xf32>
    %cst_6 = arith.constant 0.106506981 : f32
    %20 = vector.broadcast %cst_6 : f32 to vector<4x14x14xf32>
    %21 = arith.mulf %20, %19 : vector<4x14x14xf32>
    %22 = arith.addf %18, %21 : vector<4x14x14xf32>
    %c0_7 = arith.constant 0 : index
    %c0_8 = arith.constant 0 : index
    %c0_9 = arith.constant 0 : index
    %23 = vector.load %arg2[%c0_7, %c0_8, %c0_9] : memref<4x14x14xf32, #tpu.memory_space<vmem>>, vector<4x14x14xf32>
    tpu.vector_store %arg2[%c0_7, %c0_8, %c0_9], %22 {strides = array<i32>} : memref<4x14x14xf32, #tpu.memory_space<vmem>>, vector<4x14x14xf32>,
    return
  }
  func.func @transform_0(%arg0: i32) -> (i32, i32, i32) {
    %c0_i32 = arith.constant 0 : i32
    %c0_i32_0 = arith.constant 0 : i32
    %c0_i32_1 = arith.constant 0 : i32
    return %arg0, %c0_i32, %c0_i32_0 : i32, i32, i32
  }
  func.func @transform_1(%arg0: i32) -> (i32, i32, i32) {
    %c0_i32 = arith.constant 0 : i32
    %c0_i32_0 = arith.constant 0 : i32
    %c0_i32_1 = arith.constant 0 : i32
    return %arg0, %c0_i32, %c0_i32_0 : i32, i32, i32
  }
}

</mosaic_0001>

<bundles_post_ra>
// kernel: tpu_custom_call.1
= control target key start
LH: loop header
LB: loop body
LE: loop exit
PB: predicated region body
PF: predicated region fallthrough
CT: control target
= control target key end

     0   :  { %6 = vsyncpa [#allocation3], 0  ;;  %s691_s0 = inlined_call_operand.hbm [shape: f32[8,16,16], index: 0, kind: input, shape index: {}]   ;;  %s692_s1 = inlined_call_operand.vmem [shape: f32[8,14,14], index: 1, kind: output, shape index: {}]  }
   0x1   :  { %8 = vsyncpa [#allocation3 + $0x1], 0  ;;  %s558_s6 = smov 0   ;;  %s560_s7 = smov 0  }
   0x2   :  { %s562_s8 = smov 0   ;;  %s564_s9 = smov 0  }
   0x3 LB: > { %s417_s10 = sadd.s32 4294967295, %s542_s9   ;;  %s578_s11 = sadd.s32 1, %s542_s9   ;;  %s542_s9 = sphi %s564_s9, %s699_s9   ;;  %s538_s8 = sphi %s562_s8, %s698_s8   ;;  %s534_s7 = sphi %s560_s7, %s697_s7   ;;  %s530_s6 = sphi %s558_s6, %s696_s6  }
   0x4   : > { %s18_s12 = ssub.s32 %s542_s9, %s578_s11  ;;  %s21_s13 = sadd.s32 1, %s538_s8 }
   0x5   : > { %p19_p0 = scmp.eq.s32.totalorder %s18_s12, 0  ;;  %p28_p1 = scmp.ne.s32.totalorder %s538_s8, %s534_s7 }
   0x6   : > { %p29_p2 = scmp.eq.s32.totalorder %s542_s9, 0  ;;  %p34_p3 = scmp.ne.s32.totalorder %s534_s7, %s530_s6 }
   0x7   : > { %s588_s14 = scalar_select %p19_p0, %s538_s8, %s21_s13  }
   0x8   : > { %p590_p4 = por %p29_p2, %p28_p1  ;;  %p35_p5 = scmp.eq.s32.totalorder %s417_s10, 0 }
   0x9   : > { %p441_p6 = scmp.lt.s32.totalorder %s542_s9, 2  ;;  %s84_s17 = sand.u32 1, %s538_s8  }
   0xa   : > { %p597_p7 = por %p35_p5, %p34_p3  ;;  %s421_s18 = sshll.u32 %s84_s17, 6 }
   0xb   : > { %s433_s19 = sshll.u32 %s542_s9, 6  ;;  %s88_s23 = scalar_lea.vmem [#allocation2], %s421_s18 }
   0xc   : > { %s94_s22 = scalar_lea.hbm %s691_s0, %s433_s19  ;;  %s97_s24 = sshll.u32 %s88_s23, 4  ;;  %s98_s24 = int_to_ptr.vmem [resolvable:$true] %s97_s24 }
   0xd   : > { %s95_s25 = sshll.u32 %s94_s22, 4  ;;  %p608_p8 = pnand %p441_p6, %p590_p4  ;;  %s96_s25 = int_to_ptr.hbm [resolvable:$true] %s95_s25 }
   0xe   : > { %p425_p9 = scmp.ge.s32.totalorder %s542_s9, 1  ;;  %s85_s27 = scalar_lea.sflag [#allocation3], %s84_s17 }
   0xf   : > { %s478_s28 = sshra.s32 %s96_s25, 4  ;;  %p482_p11 = pneg %p608_p8  ;;  %s479_s28 = int_to_ptr.hbm [resolvable:$true] %s478_s28 }
  0x10   : > { %s480_s29 = scalar_lea.hbm %s479_s28, 64  ;;  %s485_s3 = scalar_lea.hbm %s691_s0, 128 }
  0x11   : > { %p481_p10 = scmp.ne.s32.totalorder %s479_s28, %s480_s29  ;;  %p486_p0 = scmp.lt.s32.totalorder %s479_s28, %s691_s0 }
  0x12   : > { %p487_p1 = scmp.lt.s32.totalorder %s485_s3, %s480_s29 }
  0x13   : > { %p483_p12 = pnand %p482_p11, %p481_p10 }
  0x14   : > { %p488_p2 = por %p487_p1, %p486_p0 }
  0x15   : > { %p484_p13 = pneg %p483_p12 }
  0x17   : > { %p489_p3 = pnand %p488_p2, %p484_p13 }
  0x19   : > { %492 = shalt.err (!%p489_p3)
}
  0x1a   : > { %s544_s6 = smov 128   ;;  %s545_s12 = smov 8  }
  0x1b   : > { %440 = dma.hbm_to_vmem [thread:$0]  (!%p608_p8), %s96_s25, 1024, %s98_s24, %s85_s27, %s544_s6, %s544_s6, %s545_s12  }
  0x1c   : > { %p105_p4 = scmp.lt.s32.totalorder %s542_s9, 3 }
  0x1e   : > { %p106_p5 = pnand %p425_p9, %p105_p4 }
  0x1f   : > { %s111_s13 = sand.u32 (!%p106_p5), 1, %s534_s7  }
  0x20   : > { %109 = sbr.rel (%p106_p5) target bundleno = 208 (0xd0), region = 24  ;;  %s426_s15 = sshll.u32 (!%p106_p5), %s111_s13, 6 }
  0x21   : > { %s112_s17 = scalar_lea.sflag (!%p106_p5), [#allocation3], %s111_s13  ;;  %s115_s18 = scalar_lea.vmem (!%p106_p5), [#allocation2], %s426_s15 }
  0x25   : > { %525 = dma.done.wait (%p597_p7), %s112_s17, 1024  }
  0x26   : > { %527 = vsyncadd (%p597_p7), %s112_s17, 4294966272  ;;  %v146_v0 = vld [vmem:[%s115_s18 + $0x10] sm:$0xff]  ;;  %v144_v1 = vld [vmem:[%s115_s18] sm:$0xff]  ;;  %s546_s19 = smov 127   ;;  %s547_s16 = smov 126   ;;  %vm272_vm0 = vcmask 1046528  }
  0x27   : > { %v162_v2 = vmul.f32 0.78698605, %v146_v0  ;;  %v160_v3 = vmul.f32 0.78698605, %v144_v1  ;;  %v148_v4 = vld [vmem:[%s115_s18 + $0x20] sm:$0xff]  ;;  %v147_v6 = vld [vmem:[%s115_s18 + $0x18] sm:$0xff] }
  0x28   : > { %v164_v5 = vmul.f32 0.78698605, %v148_v4  ;;  %v145_v7 = vld [vmem:[%s115_s18 + $0x8] sm:$0xff]  ;;  %v163_v9 = vmul.f32 0.78698605, %v147_v6  ;;  %v150_v12 = vld [vmem:[%s115_s18 + $0x30] sm:$0xff] }
  0x29   : > { %180 = vrot.lane.b32.xlu1 %v162_v2, %s546_s19  ;;  %176 = vrot.lane.b32.xlu0 %v160_v3, %s546_s19  ;;  %v149_v8 = vld [vmem:[%s115_s18 + $0x28] sm:$0xff]  ;;  %v161_v10 = vmul.f32 0.78698605, %v145_v7  ;;  %v152_v13 = vmul.f32 0.10650698, %v144_v1  ;;  %v151_v16 = vld [vmem:[%s115_s18 + $0x38] sm:$0xff] }
  0x2a   : > { %184 = vrot.lane.b32.xlu2 %v164_v5, %s546_s19  ;;  %v165_v11 = vmul.f32 0.78698605, %v149_v8  ;;  %v153_v14 = vmul.f32 0.10650698, %v145_v7  ;;  %v166_v15 = vmul.f32 0.78698605, %v150_v12 }
  0x2b   : > { %v154_v17 = vmul.f32 0.10650698, %v146_v0  ;;  %v167_v18 = vmul.f32 0.78698605, %v151_v16  ;;  %v155_v19 = vmul.f32 0.10650698, %v147_v6 }
  0x2c   : > { %v631_v20 = vmul.f32 0.10650698, %v148_v4  ;;  %v633_v21 = vmul.f32 0.10650698, %v149_v8  ;;  %v635_v22 = vmul.f32 0.10650698, %v150_v12 }
  0x2d   : > { %v640_v23 = vmul.f32 0.10650698, %v151_v16  ;;  %s427_s20 = sshll.u32 %s417_s10, 2  ;;  %vm309_vm1 = vcmask 1045504   ;;  %vm340_vm2 = vcmask 111616   ;;  %vm338_vm3 = vcmask 113664  }
  0x2e   : > { %p138_p6 = scmp.lt.s32.totalorder %s427_s20, 7 }
  0x30   : > { %s701_s20 = smov (!%p138_p6, %s427_s20), 7 }
  0x31   : > { %182 = vrot.lane.b32.xlu1 %v163_v9, %s546_s19  ;;  %178 = vrot.lane.b32.xlu0 %v161_v10, %s546_s19  ;;  %s434_s21 = sshll.u32 %s701_s20, 4 }
  0x32   : > { %186 = vrot.lane.b32.xlu2 %v165_v11, %s546_s19  ;;  %s648_s22 = scalar_lea.vmem %s692_s1, %s434_s21 }
  0x39   : > { %218 = vrot.lane.b32.xlu1 %v153_v14, %s547_s16  ;;  %216 = vrot.lane.b32.xlu0 %v152_v13, %s547_s16 }
  0x3a   : > { %188 = vrot.lane.b32.xlu2 %v166_v15, %s546_s19 }
  0x41   : > { %220 = vrot.lane.b32.xlu1 %v154_v17, %s547_s16  ;;  %190 = vrot.lane.b32.xlu0 %v167_v18, %s546_s19 }
  0x42   : > { %222 = vrot.lane.b32.xlu2 %v155_v19, %s547_s16 }
  0x49   : > { %226 = vrot.lane.b32.xlu1 %v633_v21, %s547_s16  ;;  %224 = vrot.lane.b32.xlu0 %v631_v20, %s547_s16 }
  0x4a   : > { %228 = vrot.lane.b32.xlu2 %v635_v22, %s547_s16 }
  0x51   : > { %230 = vrot.lane.b32.xlu0 %v640_v23, %s547_s16 }
  0x84   : > { %v185_v24 = vpop.permute.xlu2 %184 }
  0x85   : > { %v204_v4 = vadd.f32 %v185_v24, %v631_v20 }
  0x8c   : > { %v187_v25 = vpop.permute.xlu2 %186 }
  0x8d   : > { %v205_v5 = vadd.f32 %v187_v25, %v633_v21 }
  0x94   : > { %v189_v26 = vpop.permute.xlu2 %188 }
  0x95   : > { %v206_v10 = vadd.f32 %v189_v26, %v635_v22 }
  0x9b   : > { %v181_v27 = vpop.permute.xlu1 %180  ;;  %v177_v28 = vpop.permute.xlu0 %176 }
  0x9c   : > { %v223_v29 = vpop.permute.xlu2 %222  ;;  %v200_v35 = vadd.f32 %v177_v28, %v152_v13  ;;  %v202_v53 = vadd.f32 %v181_v27, %v154_v17 }
  0xa3   : > { %v183_v30 = vpop.permute.xlu1 %182  ;;  %v179_v31 = vpop.permute.xlu0 %178 }
  0xa4   : > { %v203_v32 = vadd.f32 %v183_v30, %v155_v19  ;;  %v201_v36 = vadd.f32 %v179_v31, %v153_v14  ;;  %v229_v15 = vpop.permute.xlu2 %228 }
  0xa5   : > { %v246_v20 = vadd.f32 %v229_v15, %v206_v10 }
  0xa6   : > { %v243_v33 = vadd.f32 %v223_v29, %v203_v32 }
  0xa7   : > { %v262_v30 = vmul.f32 0.78698605, %v246_v20 }
  0xa8   : > { %v259_v34 = vmul.f32 0.78698605, %v243_v33  ;;  %v251_v39 = vmul.f32 0.10650698, %v243_v33 }
  0xaa   : > { %v277_v42 = vrot.slane %v259_v34, 1  ;;  %v314_v47 = vrot.slane %v251_v39, 2  ;;  %v254_v34 = vmul.f32 0.10650698, %v246_v20 }
  0xab   : > { %v219_v37 = vpop.permute.xlu1 %218  ;;  %v217_v38 = vpop.permute.xlu0 %216 }
  0xac   : > { %v241_v40 = vadd.f32 %v219_v37, %v201_v36  ;;  %v240_v41 = vadd.f32 %v217_v38, %v200_v35  ;;  %v296_v49 = vadd.f32 %v277_v42, %v251_v39  ;;  %v282_v39 = vrot.slane %v262_v30, 1 }
  0xae   : > { %v249_v43 = vmul.f32 0.10650698, %v241_v40  ;;  %v257_v44 = vmul.f32 0.78698605, %v241_v40  ;;  %v248_v45 = vmul.f32 0.10650698, %v240_v41  ;;  %v333_v61 = vadd.f32 %v314_v47, %v296_v49 }
  0xaf   : > { %v256_v46 = vmul.f32 0.78698605, %v240_v41  ;;  %v319_v41 = vrot.slane %v254_v34, 2 }
  0xb0   : > { %v274_v48 = vrot.slane %v257_v44, 1  ;;  %v311_v50 = vrot.slane %v249_v43, 2  ;;  %v310_v52 = vrot.slane %v248_v45, 2  ;;  %343 = vst.msk [vmem:[%s648_s22 + $0x18] sm:$0x3f] %vm340_vm2, %v333_v61 }
  0xb1   : > { %v273_v51 = vrot.slane %v256_v46, 1 }
  0xb2   : > { %v294_v54 = vadd.f32 %v274_v48, %v249_v43  ;;  %v312_v62 = vsel %vm309_vm1, %v310_v52, %v311_v50 }
  0xb3   : > { %v275_v55 = vsel %vm272_vm0, %v273_v51, %v274_v48  ;;  %v221_v56 = vpop.permute.xlu1 %220  ;;  %v191_v57 = vpop.permute.xlu0 %190 }
  0xb4   : > { %v331_v58 = vadd.f32 %v311_v50, %v294_v54  ;;  %v293_v59 = vadd.f32 %v275_v55, %v248_v45  ;;  %v242_v60 = vadd.f32 %v221_v56, %v202_v53  ;;  %v207_v22 = vadd.f32 %v191_v57, %v640_v23 }
  0xb6   : > { %341 = vst.msk [vmem:[%s648_s22 + $0x8] sm:$0x3f] %vm340_vm2, %v331_v58  ;;  %v330_v63 = vadd.f32 %v312_v62, %v293_v59  ;;  %v250_v0 = vmul.f32 0.10650698, %v242_v60  ;;  %v258_v1 = vmul.f32 0.78698605, %v242_v60 }
  0xb8   : > { %339 = vst.msk [vmem:[%s648_s22] sm:$0xff] %vm338_vm3, %v330_v63  ;;  %v276_v2 = vrot.slane %v258_v1, 1  ;;  %v313_v3 = vrot.slane %v250_v0, 2 }
  0xba   : > { %v278_v6 = vsel %vm272_vm0, %v276_v2, %v277_v42  ;;  %v315_v11 = vsel %vm309_vm1, %v313_v3, %v314_v47 }
  0xbb   : > { %v295_v7 = vadd.f32 %v278_v6, %v250_v0  ;;  %v227_v8 = vpop.permute.xlu1 %226  ;;  %v225_v9 = vpop.permute.xlu0 %224 }
  0xbc   : > { %v245_v12 = vadd.f32 %v227_v8, %v205_v5  ;;  %v244_v13 = vadd.f32 %v225_v9, %v204_v4 }
  0xbd   : > { %v332_v14 = vadd.f32 %v315_v11, %v295_v7 }
  0xbe   : > { %v253_v16 = vmul.f32 0.10650698, %v245_v12  ;;  %v261_v17 = vmul.f32 0.78698605, %v245_v12  ;;  %v252_v18 = vmul.f32 0.10650698, %v244_v13 }
  0xbf   : > { %342 = vst.msk [vmem:[%s648_s22 + $0x10] sm:$0xff] %vm338_vm3, %v332_v14  ;;  %v260_v19 = vmul.f32 0.78698605, %v244_v13 }
  0xc0   : > { %v280_v21 = vrot.slane %v261_v17, 1  ;;  %v317_v24 = vrot.slane %v253_v16, 2  ;;  %v316_v27 = vrot.slane %v252_v18, 2 }
  0xc1   : > { %v279_v25 = vrot.slane %v260_v19, 1 }
  0xc2   : > { %v298_v26 = vadd.f32 %v280_v21, %v253_v16  ;;  %v318_v35 = vsel %vm309_vm1, %v316_v27, %v317_v24 }
  0xc3   : > { %v281_v28 = vsel %vm272_vm0, %v279_v25, %v280_v21  ;;  %v231_v29 = vpop.permute.xlu0 %230 }
  0xc4   : > { %v335_v31 = vadd.f32 %v317_v24, %v298_v26  ;;  %v297_v32 = vadd.f32 %v281_v28, %v252_v18  ;;  %v247_v33 = vadd.f32 %v231_v29, %v207_v22 }
  0xc6   : > { %345 = vst.msk [vmem:[%s648_s22 + $0x28] sm:$0x3f] %vm340_vm2, %v335_v31  ;;  %v334_v36 = vadd.f32 %v318_v35, %v297_v32  ;;  %v255_v37 = vmul.f32 0.10650698, %v247_v33  ;;  %v263_v38 = vmul.f32 0.78698605, %v247_v33 }
  0xc8   : > { %344 = vst.msk [vmem:[%s648_s22 + $0x20] sm:$0xff] %vm338_vm3, %v334_v36  ;;  %v283_v23 = vrot.slane %v263_v38, 1  ;;  %v320_v40 = vrot.slane %v255_v37, 2 }
  0xca   : > { %v284_v42 = vsel %vm272_vm0, %v282_v39, %v283_v23  ;;  %v300_v43 = vadd.f32 %v283_v23, %v255_v37  ;;  %v321_v45 = vsel %vm309_vm1, %v319_v41, %v320_v40 }
  0xcb   : > { %v299_v44 = vadd.f32 %v284_v42, %v254_v34 }
  0xcc   : > { %v337_v46 = vadd.f32 %v320_v40, %v300_v43 }
  0xcd   : > { %v336_v47 = vadd.f32 %v321_v45, %v299_v44 }
  0xce   : > { %347 = vst.msk [vmem:[%s648_s22 + $0x38] sm:$0x3f] %vm340_vm2, %v337_v46 }
  0xcf   : > { %346 = vst.msk [vmem:[%s648_s22 + $0x30] sm:$0xff] %vm338_vm3, %v336_v47 }
  0xd0 PF: > { %p11_p7 = scmp.ge.s32.totalorder %s578_s11, 4   ;;  %s696_s6 = smov %s534_s7 }
  0xd1   : > { %s697_s7 = smov %s538_s8  ;;  %s698_s8 = smov %s588_s14 }
  0xd2   : > { %s699_s9 = smov %s578_s11  ;;  %13 = sbr.rel (!%p11_p7) target bundleno = 3 (0x3), region = 64 }
  0xd7   :  { %372 = vsyncpa [#allocation3], 1 }
  0xd8   :  { %374 = vsyncpa [#allocation3 + $0x1], 1 }

</bundles_post_ra>
